<compile_context>
chip_gen: v7x
topology: tpu7x:2x2x1
jax: 0.10.0
libtpu: 0.0.40
codegen_flags: <defaults>
</compile_context>

<pallas_src>
import functools

import numpy as np
import jax
import jax.numpy as jnp
from jax.experimental import pallas as pl
from jax.experimental.pallas import tpu as pltpu


def _round_up(a, m):
    return (a + m - 1) // m * m


def _pick_images_per_step(N):
    """Fewer, fatter grid steps amortize per-step overhead, but keep >= 2
    steps when possible so both v7x TensorCores get work."""
    if N <= 2:
        return 1
    nb = N // 2
    while N % nb:
        nb -= 1
    return min(nb, 8)


def _make_kernel(Cin, H, W, Cout, KH, KW, pad, Nb, HWp):
    K = KH * KW * Cin

    def kernel(x_ref, w_ref, b_ref, m_ref, o_ref, patch_ref):
        # x_ref: (Nb, Cin, HWp)  flat, lane-dense images
        # w_ref: (Cout, K)       weight, column order (kh, kw, ci)
        # b_ref: (Cout, 1)
        # m_ref: (KH*KW, HWp)    {0,1} padding masks per tap
        # o_ref: (Nb, Cout, HWp) lane-dense output slab
        # patch_ref: (K, Nb*HWp) lane-dense im2col patch matrix (VMEM)
        for n in range(Nb):
            img = x_ref[n]                                  # (Cin, HWp)
            for kh in range(KH):
                for kw in range(KW):
                    t = kh * KW + kw
                    d = (kh - pad) * W + (kw - pad)         # flat tap offset
                    if d == 0:
                        shifted = img
                    else:
                        # out[q] = img[(q + d) % HWp]  (one XLU lane-rotate)
                        shifted = pltpu.roll(img, (-d) % HWp, 1)
                    tap = shifted * m_ref[t:t + 1, :]       # zero padded taps
                    r0 = t * Cin
                    patch_ref[r0:r0 + Cin, n * HWp:(n + 1) * HWp] = tap

        # Single MXU matmul, f32 accumulate; bias on the f32 accumulator.
        acc = jnp.dot(w_ref[...], patch_ref[...],
                      preferred_element_type=jnp.float32)   # (Cout, Nb*HWp)
        acc = acc + b_ref[...]
        for n in range(Nb):
            o_ref[n] = acc[:, n * HWp:(n + 1) * HWp].astype(o_ref.dtype)

    return kernel


def conv2d_pallas(x, w, b, *, stride, padding):
    """x: (N, Cin, H, W) f32.  w: (Cout, Cin, KH, KW) torch OIHW.  b: (Cout,).
    Returns (N, Cout, Ho, Wo) f32, matching nn.Conv2d(..., stride, padding)."""
    assert isinstance(stride, int) and isinstance(padding, int)
    N, Cin, H, W = x.shape
    Cout, Cin2, KH, KW = w.shape
    assert Cin == Cin2, "weight Cin must match input channels"
    # Flat-shift im2col needs padding <= 'same'; typical for BasicConv2d.
    assert 2 * padding <= KH - 1 and 2 * padding <= KW - 1, \
        "padding larger than (k-1)/2 not supported"  # TODO(synk): generalize

    Hs1 = H + 2 * padding - KH + 1          # stride-1 output dims
    Ws1 = W + 2 * padding - KW + 1
    Ho = (Hs1 - 1) // stride + 1
    Wo = (Ws1 - 1) // stride + 1
    K = KH * KW * Cin

    HW = H * W
    HWp = _round_up(HW, 128)                # lane-dense spatial axis
    x_flat = x.reshape(N, Cin, HW)          # free, contiguous view
    if HWp != HW:
        x_flat = jnp.pad(x_flat, ((0, 0), (0, 0), (0, HWp - HW)))

    # Weight -> (Cout, KH*KW*Cin), column order (kh, kw, ci) matching the
    # patch-row order; bias -> (Cout, 1) broadcasting over the lane axis.
    w_mat = jnp.transpose(w, (0, 2, 3, 1)).reshape(Cout, K)
    b_col = b.reshape(Cout, 1)

    # Per-tap {0,1} padding masks over flat output positions q = oh*W + ow.
    q = np.arange(HWp)
    oh_q, ow_q = q // W, q % W
    masks_np = np.zeros((KH * KW, HWp), np.float32)
    for kh in range(KH):
        for kw in range(KW):
            r = oh_q + kh - padding
            c = ow_q + kw - padding
            valid = (q < HW) & (r >= 0) & (r < H) & (c >= 0) & (c < W)
            masks_np[kh * KW + kw] = valid.astype(np.float32)
    masks = jnp.asarray(masks_np)

    Nb = _pick_images_per_step(N)
    grid = (N // Nb,)

    kernel = _make_kernel(Cin, H, W, Cout, KH, KW, padding, Nb, HWp)

    flops = 2 * N * HWp * K * Cout + N * HWp * Cout
    bytes_accessed = 4 * (x_flat.size + w_mat.size + b_col.size + masks.size
                          + N * Cout * HWp)

    out_flat = pl.pallas_call(
        kernel,
        out_shape=jax.ShapeDtypeStruct((N, Cout, HWp), jnp.float32),
        grid_spec=pltpu.PrefetchScalarGridSpec(
            num_scalar_prefetch=0,
            grid=grid,
            in_specs=[
                pl.BlockSpec((Nb, Cin, HWp), lambda i: (i, 0, 0)),
                pl.BlockSpec((Cout, K), lambda i: (0, 0)),
                pl.BlockSpec((Cout, 1), lambda i: (0, 0)),
                pl.BlockSpec((KH * KW, HWp), lambda i: (0, 0)),
            ],
            out_specs=pl.BlockSpec((Nb, Cout, HWp), lambda i: (i, 0, 0)),
            scratch_shapes=[
                pltpu.VMEM((K, Nb * HWp), jnp.float32),
            ],
        ),
        compiler_params=pltpu.CompilerParams(
            dimension_semantics=("parallel",),
        ),
        cost_estimate=pl.CostEstimate(
            flops=flops, transcendentals=0, bytes_accessed=bytes_accessed),
    )(x_flat, w_mat, b_col, masks)

    # Valid stride-1 outputs live at q = oh*W + ow, oh < Hs1, ow < Ws1.
    out = out_flat[:, :, :Hs1 * W].reshape(N, Cout, Hs1, W)[:, :, :, :Ws1]
    if stride > 1:
        out = out[:, :, ::stride, ::stride]
    return out


def basic_conv2d_forward(x, w, b, *, stride, padding):
    """Matches BasicConv2d.forward: return self.conv(x)."""
    return conv2d_pallas(x, w, b, stride=stride, padding=padding)


if __name__ == "__main__":
    key = jax.random.PRNGKey(0)
    kx, kw_, kb = jax.random.split(key, 3)

    # Small shapes consistent with the module: Conv2d(4 -> 8, k=3, s=1, p=1).
    N, Cin, H, W = 2, 4, 16, 16
    Cout, KH, KW = 8, 3, 3
    stride, padding = 1, 1

    x = jax.random.normal(kx, (N, Cin, H, W), jnp.float32)
    w = jax.random.normal(kw_, (Cout, Cin, KH, KW), jnp.float32) * (
        1.0 / (KH * KW * Cin) ** 0.5)
    b = jax.random.normal(kb, (Cout,), jnp.float32) * 0.05

    fwd = jax.jit(functools.partial(basic_conv2d_forward,
                                    stride=stride, padding=padding))
    out = jax.block_until_ready(fwd(x, w, b))

    # Pure-JAX reference (lax.conv in NCHW/OIHW) for correctness.
    dn = jax.lax.conv_dimension_numbers(x.shape, w.shape, ("NCHW", "OIHW", "NCHW"))
    ref = jax.lax.conv_general_dilated(
        x, w, (stride, stride), ((padding, padding), (padding, padding)),
        dimension_numbers=dn) + b.reshape(1, -1, 1, 1)

    Ho = (H + 2 * padding - KH) // stride + 1
    Wo = (W + 2 * padding - KW) // stride + 1
    assert out.shape == (N, Cout, Ho, Wo), out.shape
    assert jnp.allclose(out, ref, atol=1e-4, rtol=1e-4), "mismatch vs reference"

    print("KERNEL_OK")
</pallas_src>

<mosaic_0001>
module attributes {stable_mosaic.version = 11 : i64} {
  func.func @kernel(%arg0: i32, %arg1: memref<1x4x256xf32, #tpu.memory_space<vmem>>, %arg2: memref<8x36xf32, #tpu.memory_space<vmem>>, %arg3: memref<8x1xf32, #tpu.memory_space<vmem>>, %arg4: memref<9x256xf32, #tpu.memory_space<vmem>>, %arg5: memref<1x8x256xf32, #tpu.memory_space<vmem>>, %arg6: memref<36x256xf32, #tpu.memory_space<vmem>>) attributes {dimension_semantics = [#tpu.dimension_semantics<parallel>], iteration_bounds = array<i64: 2>, scalar_prefetch = 0 : i64, scratch_operands = 1 : i64, tpu.core_type = #tpu.core_type<tc>, window_params = [{transform_indices = @transform_0, window_bounds = array<i64: 1, 4, 256>}, {pipeline_mode = #tpu.pipeline_mode<synchronous>, transform_indices = @transform_1, window_bounds = array<i64: 8, 36>}, {pipeline_mode = #tpu.pipeline_mode<synchronous>, transform_indices = @transform_2, window_bounds = array<i64: 8, 1>}, {pipeline_mode = #tpu.pipeline_mode<synchronous>, transform_indices = @transform_3, window_bounds = array<i64: 9, 256>}, {transform_indices = @transform_4, window_bounds = array<i64: 1, 8, 256>}]} {
    %c0 = arith.constant 0 : index
    %c0_0 = arith.constant 0 : index
    %c0_1 = arith.constant 0 : index
    %0 = vector.load %arg1[%c0, %c0_0, %c0_1] : memref<1x4x256xf32, #tpu.memory_space<vmem>>, vector<1x4x256xf32>
    %1 = vector.shape_cast %0 : vector<1x4x256xf32> to vector<4x256xf32>
    %c17_i32 = arith.constant 17 : i32
    %2 = tpu.dynamic_rotate %1 by %c17_i32 dim 1 : vector<4x256xf32>, i32 -> vector<4x256xf32>
    %c0_2 = arith.constant 0 : index
    %c0_3 = arith.constant 0 : index
    %3 = vector.load %arg4[%c0_2, %c0_3] : memref<9x256xf32, #tpu.memory_space<vmem>>, vector<1x256xf32>
    %4 = vector.broadcast %3 : vector<1x256xf32> to vector<4x256xf32>
    %5 = arith.mulf %2, %4 : vector<4x256xf32>
    %c0_4 = arith.constant 0 : index
    %c0_5 = arith.constant 0 : index
    %6 = vector.load %arg6[%c0_4, %c0_5] : memref<36x256xf32, #tpu.memory_space<vmem>>, vector<4x256xf32>
    tpu.vector_store %arg6[%c0_4, %c0_5], %5 {strides = array<i32>} : memref<36x256xf32, #tpu.memory_space<vmem>>, vector<4x256xf32>,
    %c16_i32 = arith.constant 16 : i32
    %7 = tpu.dynamic_rotate %1 by %c16_i32 dim 1 : vector<4x256xf32>, i32 -> vector<4x256xf32>
    %c1 = arith.constant 1 : index
    %c0_6 = arith.constant 0 : index
    %8 = vector.load %arg4[%c1, %c0_6] : memref<9x256xf32, #tpu.memory_space<vmem>>, vector<1x256xf32>
    %9 = vector.broadcast %8 : vector<1x256xf32> to vector<4x256xf32>
    %10 = arith.mulf %7, %9 : vector<4x256xf32>
    %c4 = arith.constant 4 : index
    %c0_7 = arith.constant 0 : index
    %11 = vector.load %arg6[%c4, %c0_7] : memref<36x256xf32, #tpu.memory_space<vmem>>, vector<4x256xf32>
    tpu.vector_store %arg6[%c4, %c0_7], %10 {strides = array<i32>} : memref<36x256xf32, #tpu.memory_space<vmem>>, vector<4x256xf32>,
    %c15_i32 = arith.constant 15 : i32
    %12 = tpu.dynamic_rotate %1 by %c15_i32 dim 1 : vector<4x256xf32>, i32 -> vector<4x256xf32>
    %c2 = arith.constant 2 : index
    %c0_8 = arith.constant 0 : index
    %13 = vector.load %arg4[%c2, %c0_8] : memref<9x256xf32, #tpu.memory_space<vmem>>, vector<1x256xf32>
    %14 = vector.broadcast %13 : vector<1x256xf32> to vector<4x256xf32>
    %15 = arith.mulf %12, %14 : vector<4x256xf32>
    %c8 = arith.constant 8 : index
    %c0_9 = arith.constant 0 : index
    %16 = vector.load %arg6[%c8, %c0_9] : memref<36x256xf32, #tpu.memory_space<vmem>>, vector<4x256xf32>
    tpu.vector_store %arg6[%c8, %c0_9], %15 {strides = array<i32>} : memref<36x256xf32, #tpu.memory_space<vmem>>, vector<4x256xf32>,
    %c1_i32 = arith.constant 1 : i32
    %17 = tpu.dynamic_rotate %1 by %c1_i32 dim 1 : vector<4x256xf32>, i32 -> vector<4x256xf32>
    %c3 = arith.constant 3 : index
    %c0_10 = arith.constant 0 : index
    %18 = vector.load %arg4[%c3, %c0_10] : memref<9x256xf32, #tpu.memory_space<vmem>>, vector<1x256xf32>
    %19 = vector.broadcast %18 : vector<1x256xf32> to vector<4x256xf32>
    %20 = arith.mulf %17, %19 : vector<4x256xf32>
    %c12 = arith.constant 12 : index
    %c0_11 = arith.constant 0 : index
    %21 = vector.load %arg6[%c12, %c0_11] : memref<36x256xf32, #tpu.memory_space<vmem>>, vector<4x256xf32>
    tpu.vector_store %arg6[%c12, %c0_11], %20 {strides = array<i32>} : memref<36x256xf32, #tpu.memory_space<vmem>>, vector<4x256xf32>,
    %c4_12 = arith.constant 4 : index
    %c0_13 = arith.constant 0 : index
    %22 = vector.load %arg4[%c4_12, %c0_13] : memref<9x256xf32, #tpu.memory_space<vmem>>, vector<1x256xf32>
    %23 = vector.broadcast %22 : vector<1x256xf32> to vector<4x256xf32>
    %24 = arith.mulf %1, %23 : vector<4x256xf32>
    %c16 = arith.constant 16 : index
    %c0_14 = arith.constant 0 : index
    %25 = vector.load %arg6[%c16, %c0_14] : memref<36x256xf32, #tpu.memory_space<vmem>>, vector<4x256xf32>
    tpu.vector_store %arg6[%c16, %c0_14], %24 {strides = array<i32>} : memref<36x256xf32, #tpu.memory_space<vmem>>, vector<4x256xf32>,
    %c255_i32 = arith.constant 255 : i32
    %26 = tpu.dynamic_rotate %1 by %c255_i32 dim 1 : vector<4x256xf32>, i32 -> vector<4x256xf32>
    %c5 = arith.constant 5 : index
    %c0_15 = arith.constant 0 : index
    %27 = vector.load %arg4[%c5, %c0_15] : memref<9x256xf32, #tpu.memory_space<vmem>>, vector<1x256xf32>
    %28 = vector.broadcast %27 : vector<1x256xf32> to vector<4x256xf32>
    %29 = arith.mulf %26, %28 : vector<4x256xf32>
    %c20 = arith.constant 20 : index
    %c0_16 = arith.constant 0 : index
    %30 = vector.load %arg6[%c20, %c0_16] : memref<36x256xf32, #tpu.memory_space<vmem>>, vector<4x256xf32>
    tpu.vector_store %arg6[%c20, %c0_16], %29 {strides = array<i32>} : memref<36x256xf32, #tpu.memory_space<vmem>>, vector<4x256xf32>,
    %c241_i32 = arith.constant 241 : i32
    %31 = tpu.dynamic_rotate %1 by %c241_i32 dim 1 : vector<4x256xf32>, i32 -> vector<4x256xf32>
    %c6 = arith.constant 6 : index
    %c0_17 = arith.constant 0 : index
    %32 = vector.load %arg4[%c6, %c0_17] : memref<9x256xf32, #tpu.memory_space<vmem>>, vector<1x256xf32>
    %33 = vector.broadcast %32 : vector<1x256xf32> to vector<4x256xf32>
    %34 = arith.mulf %31, %33 : vector<4x256xf32>
    %c24 = arith.constant 24 : index
    %c0_18 = arith.constant 0 : index
    %35 = vector.load %arg6[%c24, %c0_18] : memref<36x256xf32, #tpu.memory_space<vmem>>, vector<4x256xf32>
    tpu.vector_store %arg6[%c24, %c0_18], %34 {strides = array<i32>} : memref<36x256xf32, #tpu.memory_space<vmem>>, vector<4x256xf32>,
    %c240_i32 = arith.constant 240 : i32
    %36 = tpu.dynamic_rotate %1 by %c240_i32 dim 1 : vector<4x256xf32>, i32 -> vector<4x256xf32>
    %c7 = arith.constant 7 : index
    %c0_19 = arith.constant 0 : index
    %37 = vector.load %arg4[%c7, %c0_19] : memref<9x256xf32, #tpu.memory_space<vmem>>, vector<1x256xf32>
    %38 = vector.broadcast %37 : vector<1x256xf32> to vector<4x256xf32>
    %39 = arith.mulf %36, %38 : vector<4x256xf32>
    %c28 = arith.constant 28 : index
    %c0_20 = arith.constant 0 : index
    %40 = vector.load %arg6[%c28, %c0_20] : memref<36x256xf32, #tpu.memory_space<vmem>>, vector<4x256xf32>
    tpu.vector_store %arg6[%c28, %c0_20], %39 {strides = array<i32>} : memref<36x256xf32, #tpu.memory_space<vmem>>, vector<4x256xf32>,
    %c239_i32 = arith.constant 239 : i32
    %41 = tpu.dynamic_rotate %1 by %c239_i32 dim 1 : vector<4x256xf32>, i32 -> vector<4x256xf32>
    %c8_21 = arith.constant 8 : index
    %c0_22 = arith.constant 0 : index
    %42 = vector.load %arg4[%c8_21, %c0_22] : memref<9x256xf32, #tpu.memory_space<vmem>>, vector<1x256xf32>
    %43 = vector.broadcast %42 : vector<1x256xf32> to vector<4x256xf32>
    %44 = arith.mulf %41, %43 : vector<4x256xf32>
    %c32 = arith.constant 32 : index
    %c0_23 = arith.constant 0 : index
    %45 = vector.load %arg6[%c32, %c0_23] : memref<36x256xf32, #tpu.memory_space<vmem>>, vector<4x256xf32>
    tpu.vector_store %arg6[%c32, %c0_23], %44 {strides = array<i32>} : memref<36x256xf32, #tpu.memory_space<vmem>>, vector<4x256xf32>,
    %c0_24 = arith.constant 0 : index
    %c0_25 = arith.constant 0 : index
    %46 = vector.load %arg2[%c0_24, %c0_25] : memref<8x36xf32, #tpu.memory_space<vmem>>, vector<8x36xf32>
    %c0_26 = arith.constant 0 : index
    %c0_27 = arith.constant 0 : index
    %47 = vector.load %arg6[%c0_26, %c0_27] : memref<36x256xf32, #tpu.memory_space<vmem>>, vector<36x256xf32>
    %cst = arith.constant dense<0.000000e+00> : vector<8x256xf32>
    %48 = tpu.matmul %46, %47, %cst {dimension_numbers = #tpu.dot_dimension_numbers<[1], [0], [0], [1], [0, 0, 1, 1], [], []>} : vector<8x36xf32>, vector<36x256xf32>, vector<8x256xf32> -> vector<8x256xf32>
    %c0_28 = arith.constant 0 : index
    %c0_29 = arith.constant 0 : index
    %49 = vector.load %arg3[%c0_28, %c0_29] : memref<8x1xf32, #tpu.memory_space<vmem>>, vector<8x1xf32>
    %50 = vector.broadcast %49 : vector<8x1xf32> to vector<8x256xf32>
    %51 = arith.addf %48, %50 : vector<8x256xf32>
    %c0_30 = arith.constant 0 : index
    %c0_31 = arith.constant 0 : index
    %c0_32 = arith.constant 0 : index
    %52 = vector.load %arg5[%c0_30, %c0_31, %c0_32] : memref<1x8x256xf32, #tpu.memory_space<vmem>>, vector<1x8x256xf32>
    %53 = vector.shape_cast %52 : vector<1x8x256xf32> to vector<8x256xf32>
    %54 = vector.shape_cast %51 : vector<8x256xf32> to vector<1x8x256xf32>
    tpu.vector_store %arg5[%c0_30, %c0_31, %c0_32], %54 {strides = array<i32>} : memref<1x8x256xf32, #tpu.memory_space<vmem>>, vector<1x8x256xf32>,
    return
  }
  func.func @transform_0(%arg0: i32) -> (i32, i32, i32) {
    %c0_i32 = arith.constant 0 : i32
    %c0_i32_0 = arith.constant 0 : i32
    %c0_i32_1 = arith.constant 0 : i32
    return %arg0, %c0_i32, %c0_i32_0 : i32, i32, i32
  }
  func.func @transform_1(%arg0: i32) -> (i32, i32) {
    %c0_i32 = arith.constant 0 : i32
    %c0_i32_0 = arith.constant 0 : i32
    %c0_i32_1 = arith.constant 0 : i32
    return %c0_i32, %c0_i32_0 : i32, i32
  }
  func.func @transform_2(%arg0: i32) -> (i32, i32) {
    %c0_i32 = arith.constant 0 : i32
    %c0_i32_0 = arith.constant 0 : i32
    %c0_i32_1 = arith.constant 0 : i32
    return %c0_i32, %c0_i32_0 : i32, i32
  }
  func.func @transform_3(%arg0: i32) -> (i32, i32) {
    %c0_i32 = arith.constant 0 : i32
    %c0_i32_0 = arith.constant 0 : i32
    %c0_i32_1 = arith.constant 0 : i32
    return %c0_i32, %c0_i32_0 : i32, i32
  }
  func.func @transform_4(%arg0: i32) -> (i32, i32, i32) {
    %c0_i32 = arith.constant 0 : i32
    %c0_i32_0 = arith.constant 0 : i32
    %c0_i32_1 = arith.constant 0 : i32
    return %arg0, %c0_i32, %c0_i32_0 : i32, i32, i32
  }
}

</mosaic_0001>

<bundles_post_ra>
// kernel: basic_conv2d_forward.1
= control target key start
LH: loop header
LB: loop body
LE: loop exit
PB: predicated region body
PF: predicated region fallthrough
CT: control target
= control target key end

     0   :  { %s689_s15 = smov 0   ;;  %s791_s0 = inlined_call_operand.vmem [shape: f32[2,4,256], index: 0, kind: input, shape index: {}]   ;;  %s792_s1 = inlined_call_operand.vmem [shape: f32[8,36], index: 1, kind: input, shape index: {}]   ;;  %s793_s2 = inlined_call_operand.vmem [shape: f32[8,1], index: 2, kind: input, shape index: {}]   ;;  %s794_s3 = inlined_call_operand.vmem [shape: f32[9,256], index: 3, kind: input, shape index: {}]   ;;  %s795_s4 = inlined_call_operand.vmem [shape: f32[2,8,256], index: 4, kind: output, shape index: {}]  }
   0x1 LB: > { %s594_s16 = sadd.s32 4294967295, %s652_s15   ;;  %p598_p0 = scmp.ge.s32.totalorder %s652_s15, 1  ;;  %s652_s15 = sphi %s689_s15, %s14_s15  }
   0x2   : > { %p162_p1 = scmp.lt.s32.totalorder %s652_s15, 3 }
   0x4   : > { %p163_p2 = pnand %p598_p0, %p162_p1 }
   0x5   : > { %p188_p3 = scmp.lt.s32.totalorder (!%p163_p2), %s594_s16, 1  ;;  %v206_v0 = vlaneseq (!%p163_p2)  ;;  %v606_v5 = vld [vmem:[%s794_s3 + $0x4] ss:$8 sm:$0x3] (!%p163_p2)  ;;  %s654_s23 = smov (!%p163_p2), 1   ;;  %v662_v12 = vmov (!%p163_p2), 0.0  }
   0x6   : > { %166 = sbr.rel (%p163_p2) target bundleno = 391 (0x187), region = 36  ;;  %s655_s24 = smov (!%p163_p2), 16   ;;  %530 = vmatprep.mubr.f32.mxu0 (!%p163_p2), %v662_v12  ;;  %v449_v13 = vld [vmem:[%s793_s2] sm:$0xff] (!%p163_p2)  ;;  %v663_v14 = vmov (!%p163_p2), 0   ;;  %vm459_vm8 = vcmask (!%p163_p2), 1043456   ;;  %vm455_vm9 = vcmask (!%p163_p2), 293888  }
   0x7   : > { %v214_v1 = vshrl.u32 (!%p163_p2), %v206_v0, 7  ;;  %s656_s25 = smov (!%p163_p2), 17   ;;  %s657_s26 = smov (!%p163_p2), 15   ;;  %644 = vset.pattern.permute.xlu0 (!%p163_p2), %v663_v14  ;;  %v715_v15 = vand.u32 (!%p163_p2), 127, %v206_v0 }
   0x8   : > { %s658_s27 = smov (!%p163_p2), 127   ;;  %s659_s28 = smov (!%p163_p2), 112   ;;  %v605_v16 = vld [vmem:[%s794_s3 + $0x3] ss:$8 sm:$0x3] (!%p163_p2) }
   0x9   : > { %v703_v3 = vsub.s32 (!%p163_p2), 0, %v214_v1  ;;  %v705_v4 = vsub.s32 (!%p163_p2), 1, %v214_v1  ;;  %s660_s29 = smov (!%p163_p2), 113   ;;  %s661_s30 = smov (!%p163_p2), 111   ;;  %vm285_vm0 = vcmp.lt.s32.totalorder (!%p163_p2), %v715_v15, 1  ;;  %vm208_vm1 = vcmp.lt.s32.totalorder (!%p163_p2), %v715_v15, 17 }
   0xa   : > { %v211_v21 = vld [vmem:[%s794_s3] ss:$8 sm:$0x3] (!%p163_p2)  ;;  %v603_v22 = vld [vmem:[%s794_s3 + $0x1] ss:$8 sm:$0x3] (!%p163_p2) }
   0xb   : > { %v317_v7 = vrot.slane (!%p163_p2), %v606_v5, %v703_v3  ;;  %v321_v8 = vrot.slane (!%p163_p2), %v606_v5, %v705_v4  ;;  %v294_v19 = vrot.slane (!%p163_p2), %v605_v16, %v703_v3  ;;  %v298_v20 = vrot.slane (!%p163_p2), %v605_v16, %v705_v4  ;;  %v604_v29 = vld [vmem:[%s794_s3 + $0x2] ss:$8 sm:$0x3] (!%p163_p2)  ;;  %v607_v48 = vld [vmem:[%s794_s3 + $0x5] ss:$8 sm:$0x3] (!%p163_p2) }
   0xc   : > { %vm231_vm2 = vcmp.lt.s32.totalorder (!%p163_p2), %v715_v15, 16  ;;  %v216_v27 = vrot.slane (!%p163_p2), %v211_v21, %v703_v3  ;;  %v220_v28 = vrot.slane (!%p163_p2), %v211_v21, %v705_v4  ;;  %v240_v32 = vrot.slane (!%p163_p2), %v603_v22, %v703_v3  ;;  %v609_v59 = vld [vmem:[%s794_s3 + $0x7] ss:$8 sm:$0x3] (!%p163_p2) }
   0xd   : > { %s797_s16 = smov (!%p188_p3, %s594_s16), 1  ;;  %v322_v9 = vcombine.low %v317_v7, %v321_v8  ;;  %v244_v33 = vrot.slane %v603_v22, %v705_v4  ;;  %vm261_vm3 = vcmp.lt.s32.totalorder %v715_v15, 15  ;;  %v270_v38 = vrot.slane %v604_v29, %v703_v3 }
   0xe   : > { %s616_s17 = sshll.u32 %s797_s16, 3  ;;  %v274_v39 = vrot.slane %v604_v29, %v705_v4  ;;  %vm334_vm4 = vcmp.lt.s32.totalorder %v715_v15, 127  ;;  %v343_v57 = vrot.slane %v607_v48, %v703_v3  ;;  %v347_v58 = vrot.slane %v607_v48, %v705_v4 }
   0xf   : > { %s192_s20 = scalar_lea.vmem %s791_s0, %s616_s17  ;;  %vm388_vm5 = vcmp.lt.s32.totalorder %v715_v15, 112  ;;  %v401_v5 = vrot.slane %v609_v59, %v705_v4  ;;  %vm364_vm6 = vcmp.lt.s32.totalorder %v715_v15, 113  ;;  %vm418_vm7 = vcmp.lt.s32.totalorder %v715_v15, 111 }
  0x10   : > { %v198_v2 = vld [vmem:[%s192_s20] sm:$0xff] }
  0x11   : > { %281 = vrot.lane.b32.xlu1 %v198_v2, %s654_s23  ;;  %227 = vrot.lane.b32.xlu0 %v198_v2, %s655_s24  ;;  %v200_v6 = vcombine.high %v198_v2, %v198_v2  ;;  %v324_v10 = vmul.f32 %v322_v9, %v198_v2 }
  0x13   : > { %v326_v11 = vcombine.high %v324_v10, %v324_v10  ;;  %328 = vst [vmem:[#allocation2 + $0x20] sm:$0xf] %v324_v10 }
  0x15   : > { %202 = vrot.lane.b32.xlu0 %v198_v2, %s656_s25  ;;  %283 = vrot.lane.b32.xlu1 %v200_v6, %s654_s23  ;;  %329 = vst [vmem:[#allocation2 + $0x28] sm:$0xf] %v326_v11 }
  0x19   : > { %204 = vrot.lane.b32.xlu1 %v200_v6, %s656_s25  ;;  %229 = vrot.lane.b32.xlu0 %v200_v6, %s655_s24 }
  0x1d   : > { %259 = vrot.lane.b32.xlu1 %v200_v6, %s657_s26  ;;  %257 = vrot.lane.b32.xlu0 %v198_v2, %s657_s26 }
  0x21   : > { %332 = vrot.lane.b32.xlu1 %v200_v6, %s658_s27  ;;  %330 = vrot.lane.b32.xlu0 %v198_v2, %s658_s27  ;;  %s617_s27 = sshll.u32 %s797_s16, 4 }
  0x25   : > { %386 = vrot.lane.b32.xlu1 %v200_v6, %s659_s28  ;;  %384 = vrot.lane.b32.xlu0 %v198_v2, %s659_s28 }
  0x29   : > { %362 = vrot.lane.b32.xlu1 %v200_v6, %s660_s29  ;;  %360 = vrot.lane.b32.xlu0 %v198_v2, %s660_s29 }
  0x2d   : > { %416 = vrot.lane.b32.xlu1 %v200_v6, %s661_s30  ;;  %414 = vrot.lane.b32.xlu0 %v198_v2, %s661_s30  ;;  %v397_v2 = vrot.slane %v609_v59, %v703_v3  ;;  %v608_v6 = vld [vmem:[%s794_s3 + $0x6] ss:$8 sm:$0x3]  ;;  %s197_s30 = scalar_lea.vmem %s795_s4, %s617_s27 }
  0x2e   : > { %v373_v16 = vrot.slane %v608_v6, %v703_v3 }
  0x31   : > { %452 = vperm.xlu0 %644, %v449_v13  }
  0x83   : > { %v282_v17 = vpop.permute.xlu1 %281  ;;  %v228_v18 = vpop.permute.xlu0 %227 }
  0x87   : > { %v203_v23 = vpop.permute.xlu0 %202  ;;  %v284_v24 = vpop.permute.xlu1 %283 }
  0x88   : > { %v286_v25 = vsel %vm285_vm0, %v282_v17, %v284_v24  ;;  %v287_v26 = vsel %vm285_vm0, %v284_v24, %v282_v17  ;;  %v377_v17 = vrot.slane %v608_v6, %v705_v4 }
  0x89   : > { %v301_v30 = vmul.f32 %v294_v19, %v287_v26  ;;  %v302_v31 = vmul.f32 %v298_v20, %v286_v25  ;;  %v610_v19 = vld [vmem:[%s794_s3 + $0x10] ss:$8 sm:$0x3] }
  0x8b   : > { %v305_v34 = vrot.slane %v301_v30, 4  ;;  %v306_v35 = vrot.slane %v302_v31, 4  ;;  %v205_v36 = vpop.permute.xlu1 %204  ;;  %v230_v37 = vpop.permute.xlu0 %229 }
  0x8c   : > { %v209_v40 = vsel %vm208_vm1, %v203_v23, %v205_v36  ;;  %v210_v41 = vsel %vm208_vm1, %v205_v36, %v203_v23  ;;  %v232_v42 = vsel %vm231_vm2, %v228_v18, %v230_v37  ;;  %v233_v43 = vsel %vm231_vm2, %v230_v37, %v228_v18 }
  0x8d   : > { %309 = vst [vmem:[#allocation2 + $0x10] sm:$0xf0] %v305_v34  ;;  %310 = vst [vmem:[#allocation2 + $0x18] sm:$0xf0] %v306_v35  ;;  %v223_v44 = vmul.f32 %v216_v27, %v210_v41  ;;  %v224_v45 = vmul.f32 %v220_v28, %v209_v40  ;;  %v247_v46 = vmul.f32 %v240_v32, %v233_v43 }
  0x8e   : > { %v248_v47 = vmul.f32 %v244_v33, %v232_v42  ;;  %v427_v33 = vrot.slane %v610_v19, %v703_v3  ;;  %v431_v34 = vrot.slane %v610_v19, %v705_v4 }
  0x8f   : > { %225 = vst [vmem:[#allocation2] sm:$0xf] %v223_v44  ;;  %226 = vst [vmem:[#allocation2 + $0x8] sm:$0xf] %v224_v45  ;;  %v251_v49 = vrot.slane %v247_v46, 4  ;;  %v260_v51 = vpop.permute.xlu1 %259  ;;  %v258_v52 = vpop.permute.xlu0 %257  ;;  %v438_v46 = vld [vmem:[%s792_s1] sm:$0xff] }
  0x90   : > { %v252_v50 = vrot.slane %v248_v47, 4  ;;  %v262_v53 = vsel %vm261_vm3, %v258_v52, %v260_v51  ;;  %v263_v54 = vsel %vm261_vm3, %v260_v51, %v258_v52 }
  0x91   : > { %255 = vst [vmem:[#allocation2] sm:$0xf0] %v251_v49  ;;  %v277_v55 = vmul.f32 %v270_v38, %v263_v54  ;;  %v278_v56 = vmul.f32 %v274_v39, %v262_v53 }
  0x92   : > { %256 = vst [vmem:[#allocation2 + $0x8] sm:$0xf0] %v252_v50 }
  0x93   : > { %279 = vst [vmem:[#allocation2 + $0x10] sm:$0xf] %v277_v55  ;;  %280 = vst [vmem:[#allocation2 + $0x18] sm:$0xf] %v278_v56  ;;  %v333_v60 = vpop.permute.xlu1 %332  ;;  %v331_v61 = vpop.permute.xlu0 %330 }
  0x94   : > { %v335_v62 = vsel %vm334_vm4, %v331_v61, %v333_v60  ;;  %v336_v63 = vsel %vm334_vm4, %v333_v60, %v331_v61 }
  0x95   : > { %v350_v0 = vmul.f32 %v343_v57, %v335_v62  ;;  %v351_v1 = vmul.f32 %v347_v58, %v336_v63 }
  0x97   : > { %v354_v7 = vrot.slane %v350_v0, 4  ;;  %v355_v8 = vrot.slane %v351_v1, 4  ;;  %v387_v9 = vpop.permute.xlu1 %386  ;;  %v385_v10 = vpop.permute.xlu0 %384 }
  0x98   : > { %v389_v11 = vsel %vm388_vm5, %v385_v10, %v387_v9  ;;  %v390_v12 = vsel %vm388_vm5, %v387_v9, %v385_v10  ;;  %v439_v21 = vld [vmem:[#allocation2] sm:$0xff] }
  0x99   : > { %358 = vst [vmem:[#allocation2 + $0x20] sm:$0xf0] %v354_v7  ;;  %359 = vst [vmem:[#allocation2 + $0x28] sm:$0xf0] %v355_v8  ;;  %v404_v13 = vmul.f32 %v397_v2, %v389_v11  ;;  %v405_v14 = vmul.f32 %v401_v5, %v390_v12  ;;  %v440_v18 = vld [vmem:[#allocation2 + $0x8] sm:$0xff] }
  0x9a   : > { %v442_v20 = vld [vmem:[#allocation2 + $0x18] sm:$0xff]  ;;  %v441_v22 = vld [vmem:[#allocation2 + $0x10] sm:$0xff] }
  0x9b   : > { %v408_v23 = vrot.slane %v404_v13, 4  ;;  %v409_v24 = vrot.slane %v405_v14, 4  ;;  %v363_v25 = vpop.permute.xlu1 %362  ;;  %v361_v26 = vpop.permute.xlu0 %360  ;;  %v618_v27 = vpack.c.bf16 %v442_v20, %v440_v18  ;;  %v620_v28 = vpack.c.bf16 %v441_v22, %v439_v21 }
  0x9c   : > { %v365_v29 = vsel %vm364_vm6, %v361_v26, %v363_v25  ;;  %v366_v30 = vsel %vm364_vm6, %v363_v25, %v361_v26 }
  0x9d   : > { %412 = vst [vmem:[#allocation2 + $0x30] sm:$0xf0] %v408_v23  ;;  %413 = vst [vmem:[#allocation2 + $0x38] sm:$0xf0] %v409_v24  ;;  %v380_v31 = vmul.f32 %v373_v16, %v365_v29  ;;  %v381_v32 = vmul.f32 %v377_v17, %v366_v30  ;;  %619 = vmatprep.subr.bf16.mxu0 %v618_v27 }
  0x9e   : > { %621 = vmatpush1.bf16.msra.mxu0 %v620_v28 }
  0x9f   : > { %382 = vst [vmem:[#allocation2 + $0x30] sm:$0xf] %v380_v31  ;;  %383 = vst [vmem:[#allocation2 + $0x38] sm:$0xf] %v381_v32  ;;  %v417_v35 = vpop.permute.xlu1 %416  ;;  %v415_v36 = vpop.permute.xlu0 %414 }
  0xa0   : > { %v419_v37 = vsel %vm418_vm7, %v415_v36, %v417_v35  ;;  %v420_v38 = vsel %vm418_vm7, %v417_v35, %v415_v36  ;;  %v444_v15 = vld [vmem:[#allocation2 + $0x28] sm:$0xff]  ;;  %v443_v42 = vld [vmem:[#allocation2 + $0x20] sm:$0xff] }
  0xa1   : > { %v434_v39 = vmul.f32 %v427_v33, %v419_v37  ;;  %v435_v40 = vmul.f32 %v431_v34, %v420_v38 }
  0xa3   : > { %436 = vst [vmem:[#allocation2 + $0x40] sm:$0xf] %v434_v39  ;;  %437 = vst [vmem:[#allocation2 + $0x48] sm:$0xf] %v435_v40 }
  0xa6   : > { %v446_v41 = vld [vmem:[#allocation2 + $0x38] sm:$0xff]  ;;  %v445_v43 = vld [vmem:[#allocation2 + $0x30] sm:$0xff] }
  0xa7   : > { %v622_v44 = vpack.c.bf16 %v446_v41, %v444_v15  ;;  %v624_v3 = vpack.c.bf16 %v445_v43, %v443_v42 }
  0xa9   : > { %623 = vmatprep.subr.bf16.mxu0 %v622_v44 }
  0xaa   : > { %625 = vmatpush1.bf16.msra.mxu0 %v624_v3  ;;  %v448_v4 = vld [vmem:[#allocation2 + $0x48] sm:$0xf]  ;;  %v447_v45 = vld [vmem:[#allocation2 + $0x40] sm:$0xf] }
  0xab   : > { %611 = vmatprep.subr.msk.mxu0 %vm459_vm8, %v448_v4 }
  0xae   : > { %612 = vmatpush1.msk.msra.mxu0 %vm459_vm8, %v447_v45 }
  0xaf   : > { %613 = vmatmul.mubr.msk.f32.vlgmr.msra.gmra.mrb[0].mxu0 %vm455_vm9, %v438_v46 }
  0xb0   : > { %v453_v47 = vpop.permute.xlu0 %452 }
 0x182   : > { %v532_v48 = vpop.f32.mrb[0].mxu0 }
 0x183   : > { %v533_v49 = vadd.f32 %v532_v48, %v453_v47  ;;  %v534_v50 = vpop.f32.mrb[1].mxu0 }
 0x184   : > { %v535_v51 = vadd.f32 %v534_v50, %v453_v47 }
 0x185   : > { %537 = vst [vmem:[%s197_s30] sm:$0xff] %v533_v49 }
 0x186   : > { %538 = vst [vmem:[%s197_s30 + $0x8] sm:$0xff] %v535_v51 }
 0x187 PF: > { %s14_s15 = sadd.s32 1, %s652_s15  }
 0x188   : > { %p11_p4 = scmp.ge.s32.totalorder %s14_s15, 4  }
 0x18a   :  { %13 = sbr.rel (!%p11_p4) target bundleno = 1 (0x1), region = 74 }

</bundles_post_ra>
